<compile_context>
chip_gen: v7x
topology: tpu7x:2x2x1
jax: 0.10.0
libtpu: 0.0.40
codegen_flags: <defaults>
</compile_context>

<pallas_src>
import functools

import jax
import jax.numpy as jnp
from jax import lax
from jax.experimental import pallas as pl
from jax.experimental.pallas import tpu as pltpu


# ----------------------------------------------------------------------------
# Tile choices (respect the (8, 128)-or-full-extent rule for the last 2 dims).
# ----------------------------------------------------------------------------
def _pick_th(h):
    for cand in (32, 24, 16, 8):
        if h % cand == 0:
            return cand
    return h            # full extent is always legal


def _pick_tw(w):
    return 128 if w % 128 == 0 else w   # multiple of 128, or full extent


# ----------------------------------------------------------------------------
# Pallas kernel: one (b, c, h-tile, w-tile) output block per grid step.
# ----------------------------------------------------------------------------
def _corr2cost_kernel(x_ref, o_ref, pad_ref, *, maxdisp, d, D, TH, TW, P, L,
                      nbits):
    # x_ref:   [1, 1, d, TH, TW]  input tile
    # o_ref:   [1, 1, D, TH, TW]  output tile
    # pad_ref: [P, TH, TW]        zero-padded copy of the d axis (VMEM scratch)
    j0 = pl.multiple_of(pl.program_id(3) * TW, TW)   # global column offset

    # Zero-padded signal: pad_ref[maxdisp + s] = x[s], zeros elsewhere.
    # Re-written every step so the kernel stays stateless across grid steps
    # (allows all-'parallel' semantics); these are cheap VMEM-local stores.
    if maxdisp > 0:
        pad_ref[:maxdisp] = jnp.zeros((maxdisp, TH, TW), jnp.float32)
    tail = P - (maxdisp + d)
    if tail > 0:
        pad_ref[maxdisp + d:] = jnp.zeros((tail, TH, TW), jnp.float32)
    pad_ref[maxdisp:maxdisp + d] = x_ref[0, 0]

    # Window for this w-tile: z[s', t, jl] = padded[j0 + s'].  The answer is
    # y[k, t, jl] = z[k + jl, t, jl]  (jl = lane index within the tile).
    z = pad_ref[pl.ds(j0, L)]                         # [L, TH, TW]

    # Per-lane shift by jl via binary decomposition: at each bit, lanes with
    # that bit set take the slice shifted by 2^b; the leading extent shrinks
    # as the maximum remaining shift shrinks.
    lane = lax.broadcasted_iota(jnp.int32, (1, TH, TW), 2)
    for b in reversed(range(nbits)):
        v = 1 << b
        new_l = D + v - 1
        take = (lane & v) != 0
        z = jnp.where(take, z[v:v + new_l], z[:new_l])

    o_ref[0, 0] = z                                   # [D, TH, TW]


def _corr2cost_ux(corr, maxdisp):
    """Disparity-window gather driven by the last (w) axis."""
    B, C, d, h, w = corr.shape
    D = 2 * maxdisp + 1
    TH = _pick_th(h)
    TW = _pick_tw(w)
    nbits = (TW - 1).bit_length()          # shifts 0 .. TW-1
    L = D + (1 << nbits) - 1               # window extent read per step
    P = max(maxdisp + d, (w - TW) + L)     # padded-d extent of the scratch

    kernel = functools.partial(
        _corr2cost_kernel, maxdisp=maxdisp, d=d, D=D, TH=TH, TW=TW, P=P, L=L,
        nbits=nbits)

    return pl.pallas_call(
        kernel,
        out_shape=jax.ShapeDtypeStruct((B, C, D, h, w), jnp.float32),
        grid_spec=pltpu.PrefetchScalarGridSpec(
            num_scalar_prefetch=0,
            grid=(B, C, h // TH, w // TW),
            in_specs=[
                pl.BlockSpec((1, 1, d, TH, TW),
                             lambda b, c, ih, iw: (b, c, 0, ih, iw)),
            ],
            out_specs=pl.BlockSpec((1, 1, D, TH, TW),
                                   lambda b, c, ih, iw: (b, c, 0, ih, iw)),
            scratch_shapes=[pltpu.VMEM((P, TH, TW), jnp.float32)],
        ),
        compiler_params=pltpu.CompilerParams(
            dimension_semantics=("parallel", "parallel", "parallel",
                                 "parallel")),
    )(corr)


def corr2cost_forward(corr, maxdisp=50, is_ux=True):
    """Corr2Cost.forward: corr [B, C, d, h, w] -> [B, C, 2*maxdisp+1, h, w]."""
    corr = corr.astype(jnp.float32)
    if not is_ux:
        corr = corr.transpose(0, 1, 2, 4, 3)   # shift driven by the row index
    out = _corr2cost_ux(corr, maxdisp)
    if not is_ux:
        out = out.transpose(0, 1, 2, 4, 3)
    return out


# ----------------------------------------------------------------------------
# Pure-JAX reference (for correctness checks).
# ----------------------------------------------------------------------------
def corr2cost_reference(corr, maxdisp=50, is_ux=True):
    corr = corr.astype(jnp.float32)
    B, C, d, h, w = corr.shape
    D = 2 * maxdisp + 1
    ii, jj = jnp.meshgrid(jnp.arange(h), jnp.arange(w), indexing="ij")
    base = jj if is_ux else ii
    offs = jnp.arange(D) - maxdisp
    s = base[None, :, :] + offs[:, None, None]            # [D, h, w]
    valid = (s >= 0) & (s < d)
    sc = jnp.clip(s, 0, d - 1)
    ii_b = jnp.broadcast_to(ii[None], (D, h, w))
    jj_b = jnp.broadcast_to(jj[None], (D, h, w))
    gathered = corr[:, :, sc, ii_b, jj_b]                 # [B, C, D, h, w]
    return jnp.where(valid[None, None], gathered, 0.0)


# ----------------------------------------------------------------------------
if __name__ == "__main__":
    key = jax.random.PRNGKey(0)
    configs = [
        # (B, C, d,  h,  w,   maxdisp, is_ux)
        (2, 4, 16, 16, 16, 6, True),    # square, single tile
        (2, 4, 16, 16, 16, 6, False),   # is_ux=False path
        (1, 2, 12, 8, 16, 5, True),     # d != h != w
        (1, 1, 8, 8, 256, 3, True),     # two 128-lane w tiles (j0 > 0 path)
    ]
    for idx, (B, C, d, h, w, maxdisp, is_ux) in enumerate(configs):
        key, sub = jax.random.split(key)
        corr = jax.random.normal(sub, (B, C, d, h, w), jnp.float32)
        out = jax.block_until_ready(corr2cost_forward(corr, maxdisp, is_ux))
        D = 2 * maxdisp + 1
        assert out.shape == (B, C, D, h, w), (idx, out.shape)
        ref = jax.block_until_ready(corr2cost_reference(corr, maxdisp, is_ux))
        err = float(jnp.max(jnp.abs(out - ref)))
        assert jnp.allclose(out, ref, atol=1e-6, rtol=0.0), (idx, err)
    print("KERNEL_OK")
</pallas_src>

<mosaic_0001>
module attributes {stable_mosaic.version = 11 : i64} {
  func.func @_corr2cost_kernel(%arg0: i32, %arg1: i32, %arg2: i32, %arg3: i32, %arg4: memref<1x1x16x16x16xf32, #tpu.memory_space<vmem>>, %arg5: memref<1x1x13x16x16xf32, #tpu.memory_space<vmem>>, %arg6: memref<28x16x16xf32, #tpu.memory_space<vmem>>) attributes {dimension_semantics = [#tpu.dimension_semantics<parallel>, #tpu.dimension_semantics<parallel>, #tpu.dimension_semantics<parallel>, #tpu.dimension_semantics<parallel>], iteration_bounds = array<i64: 2, 4, 1, 1>, scalar_prefetch = 0 : i64, scratch_operands = 1 : i64, tpu.core_type = #tpu.core_type<tc>, window_params = [{transform_indices = @transform_0, window_bounds = array<i64: 1, 1, 16, 16, 16>}, {transform_indices = @transform_1, window_bounds = array<i64: 1, 1, 13, 16, 16>}]} {
    %c16_i32 = arith.constant 16 : i32
    %0 = arith.muli %arg3, %c16_i32 : i32
    %1 = tpu.assume_multiple %0, 16 : i32
    %cst = arith.constant 0.000000e+00 : f32
    %2 = vector.broadcast %cst : f32 to vector<6x16x16xf32>
    %c0 = arith.constant 0 : index
    %c0_0 = arith.constant 0 : index
    %c0_1 = arith.constant 0 : index
    %3 = vector.load %arg6[%c0, %c0_0, %c0_1] : memref<28x16x16xf32, #tpu.memory_space<vmem>>, vector<6x16x16xf32>
    tpu.vector_store %arg6[%c0, %c0_0, %c0_1], %2 {strides = array<i32>} : memref<28x16x16xf32, #tpu.memory_space<vmem>>, vector<6x16x16xf32>,
    %cst_2 = arith.constant 0.000000e+00 : f32
    %4 = vector.broadcast %cst_2 : f32 to vector<6x16x16xf32>
    %c22 = arith.constant 22 : index
    %c0_3 = arith.constant 0 : index
    %c0_4 = arith.constant 0 : index
    %5 = vector.load %arg6[%c22, %c0_3, %c0_4] : memref<28x16x16xf32, #tpu.memory_space<vmem>>, vector<6x16x16xf32>
    tpu.vector_store %arg6[%c22, %c0_3, %c0_4], %4 {strides = array<i32>} : memref<28x16x16xf32, #tpu.memory_space<vmem>>, vector<6x16x16xf32>,
    %c0_5 = arith.constant 0 : index
    %c0_6 = arith.constant 0 : index
    %c0_7 = arith.constant 0 : index
    %c0_8 = arith.constant 0 : index
    %c0_9 = arith.constant 0 : index
    %6 = vector.load %arg4[%c0_5, %c0_6, %c0_7, %c0_8, %c0_9] : memref<1x1x16x16x16xf32, #tpu.memory_space<vmem>>, vector<1x1x16x16x16xf32>
    %7 = vector.shape_cast %6 : vector<1x1x16x16x16xf32> to vector<16x16x16xf32>
    %c6 = arith.constant 6 : index
    %c0_10 = arith.constant 0 : index
    %c0_11 = arith.constant 0 : index
    %8 = vector.load %arg6[%c6, %c0_10, %c0_11] : memref<28x16x16xf32, #tpu.memory_space<vmem>>, vector<16x16x16xf32>
    tpu.vector_store %arg6[%c6, %c0_10, %c0_11], %7 {strides = array<i32>} : memref<28x16x16xf32, #tpu.memory_space<vmem>>, vector<16x16x16xf32>,
    %9 = arith.index_cast %1 : i32 to index
    %c0_12 = arith.constant 0 : index
    %c0_13 = arith.constant 0 : index
    %10 = vector.load %arg6[%9, %c0_12, %c0_13] : memref<28x16x16xf32, #tpu.memory_space<vmem>>, vector<28x16x16xf32>
    %11 = tpu.iota {dimensions = array<i32: 2>} : vector<1x16x16xi32>
    %c8_i32 = arith.constant 8 : i32
    %12 = vector.broadcast %c8_i32 : i32 to vector<1x16x16xi32>
    %13 = arith.andi %11, %12 : vector<1x16x16xi32>
    %c0_i32 = arith.constant 0 : i32
    %14 = vector.broadcast %c0_i32 : i32 to vector<1x16x16xi32>
    %15 = arith.cmpi ne, %13, %14 : vector<1x16x16xi32>
    %16 = vector.extract_strided_slice %10 {offsets = [8, 0, 0], sizes = [20, 16, 16], strides = [1, 1, 1]} : vector<28x16x16xf32> to vector<20x16x16xf32>
    %17 = vector.extract_strided_slice %10 {offsets = [0, 0, 0], sizes = [20, 16, 16], strides = [1, 1, 1]} : vector<28x16x16xf32> to vector<20x16x16xf32>
    %18 = vector.shape_cast %15 : vector<1x16x16xi1> to vector<1x16x16xi1>
    %19 = vector.broadcast %18 : vector<1x16x16xi1> to vector<20x16x16xi1>
    %20 = arith.select %19, %16, %17 : vector<20x16x16xi1>, vector<20x16x16xf32>
    %c4_i32 = arith.constant 4 : i32
    %21 = vector.broadcast %c4_i32 : i32 to vector<1x16x16xi32>
    %22 = arith.andi %11, %21 : vector<1x16x16xi32>
    %c0_i32_14 = arith.constant 0 : i32
    %23 = vector.broadcast %c0_i32_14 : i32 to vector<1x16x16xi32>
    %24 = arith.cmpi ne, %22, %23 : vector<1x16x16xi32>
    %25 = vector.extract_strided_slice %20 {offsets = [4, 0, 0], sizes = [16, 16, 16], strides = [1, 1, 1]} : vector<20x16x16xf32> to vector<16x16x16xf32>
    %26 = vector.extract_strided_slice %20 {offsets = [0, 0, 0], sizes = [16, 16, 16], strides = [1, 1, 1]} : vector<20x16x16xf32> to vector<16x16x16xf32>
    %27 = vector.shape_cast %24 : vector<1x16x16xi1> to vector<1x16x16xi1>
    %28 = vector.broadcast %27 : vector<1x16x16xi1> to vector<16x16x16xi1>
    %29 = arith.select %28, %25, %26 : vector<16x16x16xi1>, vector<16x16x16xf32>
    %c2_i32 = arith.constant 2 : i32
    %30 = vector.broadcast %c2_i32 : i32 to vector<1x16x16xi32>
    %31 = arith.andi %11, %30 : vector<1x16x16xi32>
    %c0_i32_15 = arith.constant 0 : i32
    %32 = vector.broadcast %c0_i32_15 : i32 to vector<1x16x16xi32>
    %33 = arith.cmpi ne, %31, %32 : vector<1x16x16xi32>
    %34 = vector.extract_strided_slice %29 {offsets = [2, 0, 0], sizes = [14, 16, 16], strides = [1, 1, 1]} : vector<16x16x16xf32> to vector<14x16x16xf32>
    %35 = vector.extract_strided_slice %29 {offsets = [0, 0, 0], sizes = [14, 16, 16], strides = [1, 1, 1]} : vector<16x16x16xf32> to vector<14x16x16xf32>
    %36 = vector.shape_cast %33 : vector<1x16x16xi1> to vector<1x16x16xi1>
    %37 = vector.broadcast %36 : vector<1x16x16xi1> to vector<14x16x16xi1>
    %38 = arith.select %37, %34, %35 : vector<14x16x16xi1>, vector<14x16x16xf32>
    %c1_i32 = arith.constant 1 : i32
    %39 = vector.broadcast %c1_i32 : i32 to vector<1x16x16xi32>
    %40 = arith.andi %11, %39 : vector<1x16x16xi32>
    %c0_i32_16 = arith.constant 0 : i32
    %41 = vector.broadcast %c0_i32_16 : i32 to vector<1x16x16xi32>
    %42 = arith.cmpi ne, %40, %41 : vector<1x16x16xi32>
    %43 = vector.extract_strided_slice %38 {offsets = [1, 0, 0], sizes = [13, 16, 16], strides = [1, 1, 1]} : vector<14x16x16xf32> to vector<13x16x16xf32>
    %44 = vector.extract_strided_slice %38 {offsets = [0, 0, 0], sizes = [13, 16, 16], strides = [1, 1, 1]} : vector<14x16x16xf32> to vector<13x16x16xf32>
    %45 = vector.shape_cast %42 : vector<1x16x16xi1> to vector<1x16x16xi1>
    %46 = vector.broadcast %45 : vector<1x16x16xi1> to vector<13x16x16xi1>
    %47 = arith.select %46, %43, %44 : vector<13x16x16xi1>, vector<13x16x16xf32>
    %c0_17 = arith.constant 0 : index
    %c0_18 = arith.constant 0 : index
    %c0_19 = arith.constant 0 : index
    %c0_20 = arith.constant 0 : index
    %c0_21 = arith.constant 0 : index
    %48 = vector.load %arg5[%c0_17, %c0_18, %c0_19, %c0_20, %c0_21] : memref<1x1x13x16x16xf32, #tpu.memory_space<vmem>>, vector<1x1x13x16x16xf32>
    %49 = vector.shape_cast %48 : vector<1x1x13x16x16xf32> to vector<13x16x16xf32>
    %50 = vector.shape_cast %47 : vector<13x16x16xf32> to vector<1x1x13x16x16xf32>
    tpu.vector_store %arg5[%c0_17, %c0_18, %c0_19, %c0_20, %c0_21], %50 {strides = array<i32>} : memref<1x1x13x16x16xf32, #tpu.memory_space<vmem>>, vector<1x1x13x16x16xf32>,
    return
  }
  func.func @transform_0(%arg0: i32, %arg1: i32, %arg2: i32, %arg3: i32) -> (i32, i32, i32, i32, i32) {
    %c0_i32 = arith.constant 0 : i32
    %c0_i32_0 = arith.constant 0 : i32
    return %arg0, %arg1, %c0_i32, %arg2, %arg3 : i32, i32, i32, i32, i32
  }
  func.func @transform_1(%arg0: i32, %arg1: i32, %arg2: i32, %arg3: i32) -> (i32, i32, i32, i32, i32) {
    %c0_i32 = arith.constant 0 : i32
    %c0_i32_0 = arith.constant 0 : i32
    return %arg0, %arg1, %c0_i32, %arg2, %arg3 : i32, i32, i32, i32, i32
  }
}

</mosaic_0001>

<bundles_post_ra>
// kernel: tpu_custom_call.1
= control target key start
LH: loop header
LB: loop body
LE: loop exit
PB: predicated region body
PF: predicated region fallthrough
CT: control target
= control target key end

     0   :  { %6 = vsyncpa [#allocation4], 0  ;;  %s1579_s0 = inlined_call_operand.hbm [shape: f32[2,4,16,16,16], index: 0, kind: input, shape index: {}]   ;;  %s1580_s1 = inlined_call_operand.hbm [shape: f32[2,4,13,16,16], index: 1, kind: output, shape index: {}]  }
   0x1   :  { %8 = vsyncpa [#allocation4 + $0x1], 0 }
   0x2   :  { %9 = vsyncpa [#allocation5], 0 }
   0x3   :  { %11 = vsyncpa [#allocation5 + $0x1], 0  ;;  %s869_s6 = smov 0   ;;  %s871_s7 = smov 0  }
   0x4   :  { %s873_s8 = smov 0   ;;  %s875_s9 = smov 0  }
   0x5   :  { %s877_s10 = smov 0   ;;  %s879_s11 = smov 0  }
   0x6   :  { %s881_s12 = smov 0   ;;  %s883_s13 = smov 0  }
   0x7 LB: > { %s623_s14 = sadd.s32 4294967295, %s850_s13   ;;  %s624_s15 = sadd.s32 4294967294, %s850_s13   ;;  %s850_s13 = sphi %s883_s13, %s17_s13   ;;  %s846_s12 = sphi %s881_s12, %s1603_s12   ;;  %s842_s11 = sphi %s879_s11, %s1602_s11   ;;  %s838_s10 = sphi %s877_s10, %s1601_s10   ;;  %s834_s9 = sphi %s875_s9, %s1600_s9   ;;  %s830_s8 = sphi %s873_s8, %s1599_s8   ;;  %s826_s7 = sphi %s871_s7, %s1598_s7   ;;  %s822_s6 = sphi %s869_s6, %s1597_s6  }
   0x8   : > { %s39_s16 = sadd.s32 1, %s842_s11  ;;  %s43_s17 = sadd.s32 1, %s846_s12 }
   0x9   : > { %p41_p0 = scmp.ge.s32.totalorder %s39_s16, 4  ;;  %s56_s18 = sadd.s32 1, %s830_s8 }
   0xa   : > { %p63_p1 = scmp.ne.s32.totalorder %s830_s8, %s826_s7  ;;  %p64_p2 = scmp.eq.s32.totalorder %s850_s13, 0 }
   0xb   : > { %s1605_s16 = smov (%p41_p0, %s39_s16), 0  ;;  %s1607_s17 = smov (!%p41_p0, %s43_s17), %s846_s12 }
   0xc   : > { %s48_s19 = ssub.s32 %s842_s11, %s1605_s16  ;;  %p922_p3 = por %p64_p2, %p63_p1 }
   0xd   : > { %p45_p4 = scmp.ge.s32.totalorder %s1607_s17, 2  ;;  %p69_p5 = scmp.ne.s32.totalorder %s826_s7, %s822_s6 }
   0xe   : > { %p70_p6 = scmp.eq.s32.totalorder %s623_s14, 0  ;;  %p99_p7 = scmp.eq.s32.totalorder %s623_s14, 7 }
   0xf   : > { %s1609_s17 = smov (%p45_p4, %s1607_s17), 0  ;;  %p105_p10 = scmp.eq.s32.totalorder %s624_s15, 7 }
  0x10   : > { %p930_p8 = por %p70_p6, %p69_p5  ;;  %p934_p9 = por %p99_p7, %p63_p1 }
  0x11   : > { %s47_s23 = ssub.s32 %s846_s12, %s1609_s17  ;;  %p940_p12 = por %p105_p10, %p69_p5 }
  0x12   : > { %s1584_s22 = scalar_select %p934_p9, 1, 0 }
  0x13   : > { %s49_s24 = sor.u32 %s48_s19, %s47_s23  ;;  %p651_p13 = scmp.lt.s32.totalorder %s850_s13, 8 }
  0x14   : > { %p54_p11 = scmp.eq.s32.totalorder %s49_s24, 0  ;;  %s125_s26 = sand.u32 1, %s830_s8  }
  0x15   : > { %s1585_s25 = scalar_select %p940_p12, 1, 0 }
  0x16   : > { %s947_s27 = scalar_select %p54_p11, %s830_s8, %s56_s18  }
  0x17   : > { %s627_s28 = sshll.u32 %s125_s26, 8  ;;  %s628_s29 = sshll.u32 %s842_s11, 5 }
  0x18   : > { %s629_s30 = sshll.u32 %s846_s12, 7  ;;  %s129_s2 = scalar_lea.vmem [#allocation3], %s627_s28 }
  0x19   : > { %s141_s3 = sshll.u32 %s129_s2, 4  ;;  %s138_s4 = sadd.s32 %s629_s30, %s628_s29  ;;  %s951_s3 = int_to_ptr.vmem [resolvable:$true] %s141_s3 }
  0x1a   : > { %s630_s5 = sshll.u32 %s138_s4, 7  ;;  %p955_p0 = pnand %p651_p13, %p922_p3 }
  0x1b   : > { %s962_s18 = scalar_lea.hbm %s1579_s0, %s630_s5  ;;  %s964_s23 = scalar_lea.sflag [#allocation4], %s125_s26 }
  0x1c   : > { %s722_s24 = scalar_lea.hbm %s962_s18, 4096  ;;  %p724_p2 = pneg %p955_p0 }
  0x1d   : > { %p723_p1 = scmp.ne.s32.totalorder %s962_s18, %s722_s24  ;;  %s727_s29 = scalar_lea.hbm %s1579_s0, 32768 }
  0x1e   : > { %p728_p5 = scmp.lt.u32.totalorder %s962_s18, %s1579_s0  ;;  %p729_p6 = scmp.lt.u32.totalorder %s727_s29, %s722_s24 }
  0x1f   : > { %p725_p3 = pnand %p724_p2, %p723_p1  ;;  %p731_p10 = scmp.lt.u32.totalorder %s722_s24, %s962_s18 }
  0x20   : > { %p730_p7 = por %p729_p6, %p728_p5 }
  0x21   : > { %p726_p4 = pneg %p725_p3 }
  0x22   : > { %p732_p11 = por %p731_p10, %p730_p7 }
  0x24   : > { %p733_p13 = pnand %p732_p11, %p726_p4 }
  0x26   : > { %736 = shalt.err (!%p733_p13)
}
  0x27   : > { %s737_s26 = scalar_lea.vmem %s951_s3, 4096  ;;  %s852_s4 = smov [#allocation3]  }
  0x28   : > { %p738_p1 = scmp.ne.s32.totalorder %s951_s3, %s737_s26  ;;  %s742_s5 = sshll.u32 %s852_s4, 4  ;;  %s743_s5 = int_to_ptr.vmem [resolvable:$false] %s742_s5 }
  0x29   : > { %s744_s15 = scalar_lea.vmem %s743_s5, 8192  ;;  %p745_p9 = scmp.lt.s32.totalorder %s951_s3, %s743_s5 }
  0x2a   : > { %p740_p3 = pnand %p738_p1, %p724_p2  ;;  %p746_p5 = scmp.lt.s32.totalorder %s744_s15, %s737_s26 }
  0x2c   : > { %p741_p12 = pneg %p740_p3  ;;  %p747_p6 = por %p746_p5, %p745_p9 }
  0x2e   : > { %p748_p7 = pnand %p747_p6, %p741_p12 }
  0x30   : > { %751 = shalt.err (!%p748_p7)
}
  0x31   : > { %s853_s19 = smov 128   ;;  %s854_s24 = smov 8  }
  0x32   : > { %646 = dma.hbm_to_vmem [thread:$0]  (!%p955_p0), %s962_s18, 4096, %s951_s3, %s964_s23, %s853_s19, %s853_s19, %s854_s24  }
  0x33   : > { %p631_p2 = scmp.ge.s32.totalorder %s850_s13, 1  ;;  %p149_p4 = scmp.lt.s32.totalorder %s850_s13, 9 }
  0x35   : > { %p150_p10 = pnand %p631_p2, %p149_p4 }
  0x36   : > { %s995_s20 = sand.u32 (!%p150_p10), 1, %s826_s7  }
  0x37   : > { %153 = sbr.rel (%p150_p10) target bundleno = 138 (0x8a), region = 24  ;;  %s632_s28 = sshll.u32 (!%p150_p10), %s995_s20, 8 }
  0x38   : > { %s156_s29 = scalar_lea.sflag (!%p150_p10), [#allocation4], %s995_s20  ;;  %s999_s30 = scalar_lea.vmem (!%p150_p10), [#allocation3], %s632_s28 }
  0x3e   : > { %813 = dma.done.wait (%p930_p8), %s156_s29, 4096  }
  0x3f   : > { %815 = vsyncadd (%p930_p8), %s156_s29, 4294963200  ;;  %vm181_vm0 = vcmask 130048   ;;  %v855_v0 = vmov 0.0   ;;  %v330_v1 = vlaneseq  ;;  %v207_v2 = vld [vmem:[%s999_s30] sm:$0xff]  ;;  %v208_v3 = vld [vmem:[%s999_s30 + $0x8] sm:$0xff]  ;;  %s636_s21 = smul.u32 208, %s995_s20 }
  0x40   : > { %182 = vst.msk [vmem:[#allocation2] sm:$0xff] %vm181_vm0, %v855_v0  ;;  %183 = vst.msk [vmem:[#allocation2 + $0x8] sm:$0xff] %vm181_vm0, %v855_v0  ;;  %v209_v4 = vld [vmem:[%s999_s30 + $0x10] sm:$0xff]  ;;  %v210_v5 = vld [vmem:[%s999_s30 + $0x18] sm:$0xff]  ;;  %s637_s14 = smul.u32 26, %s834_s9  ;;  %s501_s5 = scalar_lea.sflag [#allocation5], %s995_s20 }
  0x41   : > { %184 = vst.msk [vmem:[#allocation2 + $0x10] sm:$0xff] %vm181_vm0, %v855_v0  ;;  %185 = vst.msk [vmem:[#allocation2 + $0x18] sm:$0xff] %vm181_vm0, %v855_v0  ;;  %v211_v6 = vld [vmem:[%s999_s30 + $0x20] sm:$0xff]  ;;  %v212_v7 = vld [vmem:[%s999_s30 + $0x28] sm:$0xff]  ;;  %v1050_v14 = vand.u32 127, %v330_v1  ;;  %s1179_s3 = scalar_lea.vmem [#allocation6], %s636_s21 }
  0x42   : > { %186 = vst.msk [vmem:[#allocation2 + $0x20] sm:$0xff] %vm181_vm0, %v855_v0  ;;  %187 = vst.msk [vmem:[#allocation2 + $0x28] sm:$0xff] %vm181_vm0, %v855_v0  ;;  %v213_v8 = vld [vmem:[%s999_s30 + $0x30] sm:$0xff]  ;;  %v214_v9 = vld [vmem:[%s999_s30 + $0x38] sm:$0xff]  ;;  %s638_s18 = smul.u32 104, %s838_s10  ;;  %s519_s23 = sshll.u32 %s1179_s3, 4  ;;  %s1521_s23 = int_to_ptr.vmem [resolvable:$true] %s519_s23 }
  0x43   : > { %188 = vst.msk [vmem:[#allocation2 + $0x30] sm:$0xff] %vm181_vm0, %v855_v0  ;;  %189 = vst.msk [vmem:[#allocation2 + $0x38] sm:$0xff] %vm181_vm0, %v855_v0  ;;  %v215_v10 = vld [vmem:[%s999_s30 + $0x40] sm:$0xff]  ;;  %v216_v11 = vld [vmem:[%s999_s30 + $0x48] sm:$0xff]  ;;  %v332_v27 = vand.u32 8, %v1050_v14  ;;  %v376_v34 = vand.u32 4, %v1050_v14 }
  0x44   : > { %190 = vst.msk [vmem:[#allocation2 + $0x40] sm:$0xff] %vm181_vm0, %v855_v0  ;;  %191 = vst.msk [vmem:[#allocation2 + $0x48] sm:$0xff] %vm181_vm0, %v855_v0  ;;  %v217_v12 = vld [vmem:[%s999_s30 + $0x50] sm:$0xff]  ;;  %v218_v13 = vld [vmem:[%s999_s30 + $0x58] sm:$0xff]  ;;  %v412_v38 = vand.u32 2, %v1050_v14  ;;  %v444_v43 = vand.u32 1, %v1050_v14  ;;  %s1456_s10 = sadd.s32 %s638_s18, %s637_s14 }
  0x45   : > { %192 = vst.msk [vmem:[#allocation2 + $0x50] sm:$0xff] %vm181_vm0, %v855_v0  ;;  %193 = vst.msk [vmem:[#allocation2 + $0x58] sm:$0xff] %vm181_vm0, %v855_v0  ;;  %v219_v15 = vld [vmem:[%s999_s30 + $0x60] sm:$0xff]  ;;  %v220_v16 = vld [vmem:[%s999_s30 + $0x68] sm:$0xff]  ;;  %vm1098_vm1 = vcmp.ne.s32.totalorder %v332_v27, 0  ;;  %vm1106_vm2 = vcmp.ne.s32.totalorder %v376_v34, 0 }
  0x46   : > { %195 = vst.msk [vmem:[#allocation2 + $0x160] sm:$0xff] %vm181_vm0, %v855_v0  ;;  %196 = vst.msk [vmem:[#allocation2 + $0x168] sm:$0xff] %vm181_vm0, %v855_v0  ;;  %v221_v17 = vld [vmem:[%s999_s30 + $0x70] sm:$0xff]  ;;  %v222_v18 = vld [vmem:[%s999_s30 + $0x78] sm:$0xff]  ;;  %vm1121_vm3 = vcmp.ne.s32.totalorder %v412_v38, 0  ;;  %vm1140_vm4 = vcmp.ne.s32.totalorder %v444_v43, 0 }
  0x47   : > { %197 = vst.msk [vmem:[#allocation2 + $0x170] sm:$0xff] %vm181_vm0, %v855_v0  ;;  %198 = vst.msk [vmem:[#allocation2 + $0x178] sm:$0xff] %vm181_vm0, %v855_v0  ;;  %v223_v19 = vld [vmem:[%s999_s30 + $0x80] sm:$0xff]  ;;  %v224_v20 = vld [vmem:[%s999_s30 + $0x88] sm:$0xff]  ;;  %s633_s9 = sshll.u32 %s1456_s10, 7  ;;  %s752_s15 = scalar_lea.vmem %s1521_s23, 3328 }
  0x48   : > { %199 = vst.msk [vmem:[#allocation2 + $0x180] sm:$0xff] %vm181_vm0, %v855_v0  ;;  %200 = vst.msk [vmem:[#allocation2 + $0x188] sm:$0xff] %vm181_vm0, %v855_v0  ;;  %v225_v21 = vld [vmem:[%s999_s30 + $0x90] sm:$0xff]  ;;  %v226_v22 = vld [vmem:[%s999_s30 + $0x98] sm:$0xff]  ;;  %s1519_s4 = scalar_lea.hbm %s1580_s1, %s633_s9  ;;  %p753_p8 = scmp.ne.s32.totalorder %s1521_s23, %s752_s15 }
  0x49   : > { %201 = vst.msk [vmem:[#allocation2 + $0x190] sm:$0xff] %vm181_vm0, %v855_v0  ;;  %202 = vst.msk [vmem:[#allocation2 + $0x198] sm:$0xff] %vm181_vm0, %v855_v0  ;;  %v227_v23 = vld [vmem:[%s999_s30 + $0xa0] sm:$0xff]  ;;  %v228_v24 = vld [vmem:[%s999_s30 + $0xa8] sm:$0xff]  ;;  %p1595_p9 = scmp.ne.s32.totalorder %s1584_s22, 0  ;;  %s856_s19 = smov [#allocation6]  }
  0x4a   : > { %203 = vst.msk [vmem:[#allocation2 + $0x1a0] sm:$0xff] %vm181_vm0, %v855_v0  ;;  %204 = vst.msk [vmem:[#allocation2 + $0x1a8] sm:$0xff] %vm181_vm0, %v855_v0  ;;  %v229_v25 = vld [vmem:[%s999_s30 + $0xb0] sm:$0xff]  ;;  %v230_v26 = vld [vmem:[%s999_s30 + $0xb8] sm:$0xff]  ;;  %s756_s24 = sshll.u32 %s856_s19, 4  ;;  %s757_s24 = int_to_ptr.vmem [resolvable:$false] %s756_s24 }
  0x4b   : > { %205 = vst.msk [vmem:[#allocation2 + $0x1b0] sm:$0xff] %vm181_vm0, %v855_v0  ;;  %206 = vst.msk [vmem:[#allocation2 + $0x1b8] sm:$0xff] %vm181_vm0, %v855_v0  ;;  %v231_v28 = vld [vmem:[%s999_s30 + $0xc0] sm:$0xff]  ;;  %v232_v29 = vld [vmem:[%s999_s30 + $0xc8] sm:$0xff]  ;;  %p754_p12 = pnand %p753_p8, %p1595_p9  ;;  %s758_s28 = scalar_lea.vmem %s757_s24, 6656 }
  0x4c   : > { %240 = vst.msk [vmem:[#allocation2 + $0x60] sm:$0xff] %vm181_vm0, %v207_v2  ;;  %241 = vst.msk [vmem:[#allocation2 + $0x68] sm:$0xff] %vm181_vm0, %v208_v3  ;;  %v233_v30 = vld [vmem:[%s999_s30 + $0xd0] sm:$0xff]  ;;  %v234_v31 = vld [vmem:[%s999_s30 + $0xd8] sm:$0xff]  ;;  %p759_p11 = scmp.lt.s32.totalorder %s1521_s23, %s757_s24  ;;  %p760_p13 = scmp.lt.s32.totalorder %s758_s28, %s752_s15 }
  0x4d   : > { %242 = vst.msk [vmem:[#allocation2 + $0x70] sm:$0xff] %vm181_vm0, %v209_v4  ;;  %243 = vst.msk [vmem:[#allocation2 + $0x78] sm:$0xff] %vm181_vm0, %v210_v5  ;;  %v235_v32 = vld [vmem:[%s999_s30 + $0xe0] sm:$0xff]  ;;  %v236_v33 = vld [vmem:[%s999_s30 + $0xe8] sm:$0xff]  ;;  %p755_p0 = pneg %p754_p12 }
  0x4e   : > { %244 = vst.msk [vmem:[#allocation2 + $0x80] sm:$0xff] %vm181_vm0, %v211_v6  ;;  %245 = vst.msk [vmem:[#allocation2 + $0x88] sm:$0xff] %vm181_vm0, %v212_v7  ;;  %v237_v35 = vld [vmem:[%s999_s30 + $0xf0] sm:$0xff]  ;;  %v238_v36 = vld [vmem:[%s999_s30 + $0xf8] sm:$0xff]  ;;  %p761_p1 = por %p760_p13, %p759_p11 }
  0x4f   : > { %246 = vst.msk [vmem:[#allocation2 + $0x90] sm:$0xff] %vm181_vm0, %v213_v8  ;;  %247 = vst.msk [vmem:[#allocation2 + $0x98] sm:$0xff] %vm181_vm0, %v214_v9  ;;  %v274_v37 = vld [vmem:[#allocation2] sm:$0xff]  ;;  %v276_v39 = vld [vmem:[#allocation2 + $0x10] sm:$0xff] }
  0x50   : > { %248 = vst.msk [vmem:[#allocation2 + $0xa0] sm:$0xff] %vm181_vm0, %v215_v10  ;;  %249 = vst.msk [vmem:[#allocation2 + $0xa8] sm:$0xff] %vm181_vm0, %v216_v11  ;;  %v278_v40 = vld [vmem:[#allocation2 + $0x20] sm:$0xff]  ;;  %v280_v41 = vld [vmem:[#allocation2 + $0x30] sm:$0xff]  ;;  %p762_p3 = pnand %p761_p1, %p755_p0 }
  0x51   : > { %250 = vst.msk [vmem:[#allocation2 + $0xb0] sm:$0xff] %vm181_vm0, %v217_v12  ;;  %251 = vst.msk [vmem:[#allocation2 + $0xb8] sm:$0xff] %vm181_vm0, %v218_v13  ;;  %v282_v44 = vld [vmem:[#allocation2 + $0x40] sm:$0xff]  ;;  %v284_v45 = vld [vmem:[#allocation2 + $0x50] sm:$0xff] }
  0x52   : > { %252 = vst.msk [vmem:[#allocation2 + $0xc0] sm:$0xff] %vm181_vm0, %v219_v15  ;;  %253 = vst.msk [vmem:[#allocation2 + $0xc8] sm:$0xff] %vm181_vm0, %v220_v16  ;;  %v275_v4 = vld [vmem:[#allocation2 + $0x8] sm:$0xff]  ;;  %v277_v5 = vld [vmem:[#allocation2 + $0x18] sm:$0xff] }
  0x53   : > { %254 = vst.msk [vmem:[#allocation2 + $0xd0] sm:$0xff] %vm181_vm0, %v221_v17  ;;  %255 = vst.msk [vmem:[#allocation2 + $0xd8] sm:$0xff] %vm181_vm0, %v222_v18  ;;  %v286_v46 = vld [vmem:[#allocation2 + $0x60] sm:$0xff]  ;;  %v279_v6 = vld [vmem:[#allocation2 + $0x28] sm:$0xff] }
  0x54   : > { %256 = vst.msk [vmem:[#allocation2 + $0xe0] sm:$0xff] %vm181_vm0, %v223_v19  ;;  %257 = vst.msk [vmem:[#allocation2 + $0xe8] sm:$0xff] %vm181_vm0, %v224_v20  ;;  %v288_v47 = vld [vmem:[#allocation2 + $0x70] sm:$0xff]  ;;  %v281_v10 = vld [vmem:[#allocation2 + $0x38] sm:$0xff] }
  0x55   : > { %258 = vst.msk [vmem:[#allocation2 + $0xf0] sm:$0xff] %vm181_vm0, %v225_v21  ;;  %259 = vst.msk [vmem:[#allocation2 + $0xf8] sm:$0xff] %vm181_vm0, %v226_v22  ;;  %v290_v48 = vld [vmem:[#allocation2 + $0x80] sm:$0xff]  ;;  %v283_v11 = vld [vmem:[#allocation2 + $0x48] sm:$0xff] }
  0x56   : > { %260 = vst.msk [vmem:[#allocation2 + $0x100] sm:$0xff] %vm181_vm0, %v227_v23  ;;  %261 = vst.msk [vmem:[#allocation2 + $0x108] sm:$0xff] %vm181_vm0, %v228_v24  ;;  %v1104_v49 = vld [vmem:[#allocation2 + $0x90] sm:$0xff]  ;;  %v336_v54 = vsel %vm1098_vm1, %v290_v48, %v274_v37  ;;  %v285_v12 = vld [vmem:[#allocation2 + $0x58] sm:$0xff] }
  0x57   : > { %262 = vst.msk [vmem:[#allocation2 + $0x110] sm:$0xff] %vm181_vm0, %v229_v25  ;;  %263 = vst.msk [vmem:[#allocation2 + $0x118] sm:$0xff] %vm181_vm0, %v230_v26  ;;  %v1110_v51 = vld [vmem:[#allocation2 + $0xa0] sm:$0xff]  ;;  %v338_v55 = vsel %vm1098_vm1, %v1104_v49, %v276_v39  ;;  %v287_v15 = vld [vmem:[#allocation2 + $0x68] sm:$0xff] }
  0x58   : > { %264 = vst.msk [vmem:[#allocation2 + $0x120] sm:$0xff] %vm181_vm0, %v231_v28  ;;  %265 = vst.msk [vmem:[#allocation2 + $0x128] sm:$0xff] %vm181_vm0, %v232_v29  ;;  %v1112_v52 = vld [vmem:[#allocation2 + $0xb0] sm:$0xff]  ;;  %v340_v60 = vsel %vm1098_vm1, %v1110_v51, %v278_v40  ;;  %v289_v16 = vld [vmem:[#allocation2 + $0x78] sm:$0xff] }
  0x59   : > { %266 = vst.msk [vmem:[#allocation2 + $0x130] sm:$0xff] %vm181_vm0, %v233_v30  ;;  %267 = vst.msk [vmem:[#allocation2 + $0x138] sm:$0xff] %vm181_vm0, %v234_v31  ;;  %v1114_v53 = vld [vmem:[#allocation2 + $0xc0] sm:$0xff]  ;;  %v342_v61 = vsel %vm1098_vm1, %v1112_v52, %v280_v41  ;;  %v291_v17 = vld [vmem:[#allocation2 + $0x88] sm:$0xff] }
  0x5a   : > { %268 = vst.msk [vmem:[#allocation2 + $0x140] sm:$0xff] %vm181_vm0, %v235_v32  ;;  %269 = vst.msk [vmem:[#allocation2 + $0x148] sm:$0xff] %vm181_vm0, %v236_v33  ;;  %v1125_v57 = vld [vmem:[#allocation2 + $0xd0] sm:$0xff]  ;;  %v344_v62 = vsel %vm1098_vm1, %v1114_v53, %v282_v44  ;;  %v293_v19 = vld [vmem:[#allocation2 + $0x98] sm:$0xff]  ;;  %v337_v22 = vsel %vm1098_vm1, %v291_v17, %v275_v4 }
  0x5b   : > { %270 = vst.msk [vmem:[#allocation2 + $0x150] sm:$0xff] %vm181_vm0, %v237_v35  ;;  %271 = vst.msk [vmem:[#allocation2 + $0x158] sm:$0xff] %vm181_vm0, %v238_v36  ;;  %v1127_v58 = vld [vmem:[#allocation2 + $0xe0] sm:$0xff]  ;;  %v346_v0 = vsel %vm1098_vm1, %v1125_v57, %v284_v45  ;;  %v380_v3 = vsel %vm1106_vm2, %v344_v62, %v336_v54  ;;  %v295_v20 = vld [vmem:[#allocation2 + $0xa8] sm:$0xff]  ;;  %v339_v26 = vsel %vm1098_vm1, %v293_v19, %v277_v5 }
  0x5c   : > { %v1129_v59 = vld [vmem:[#allocation2 + $0xf0] sm:$0xff]  ;;  %v1150_v1 = vsel %vm1098_vm1, %v1127_v58, %v286_v46  ;;  %v382_v7 = vsel %vm1106_vm2, %v346_v0, %v338_v55  ;;  %v1173_v21 = vld [vmem:[#allocation2 + $0xb8] sm:$0xff]  ;;  %v1183_v23 = vld [vmem:[#allocation2 + $0xc8] sm:$0xff]  ;;  %v341_v27 = vsel %vm1098_vm1, %v295_v20, %v279_v6 }
  0x5d   : > { %v1155_v2 = vsel %vm1098_vm1, %v1129_v59, %v288_v47  ;;  %v384_v8 = vsel %vm1106_vm2, %v1150_v1, %v340_v60  ;;  %v1185_v24 = vld [vmem:[#allocation2 + $0xd8] sm:$0xff]  ;;  %v1187_v25 = vld [vmem:[#allocation2 + $0xe8] sm:$0xff]  ;;  %v343_v28 = vsel %vm1098_vm1, %v1173_v21, %v281_v10  ;;  %v345_v30 = vsel %vm1098_vm1, %v1183_v23, %v283_v11  ;;  %v1207_v33 = vld [vmem:[#allocation2 + $0x100] sm:$0xff] }
  0x5e   : > { %v386_v9 = vsel %vm1106_vm2, %v1155_v2, %v342_v61  ;;  %v416_v13 = vsel %vm1121_vm3, %v384_v8, %v380_v3  ;;  %v1196_v29 = vld [vmem:[#allocation2 + $0xf8] sm:$0xff]  ;;  %v347_v31 = vsel %vm1098_vm1, %v1185_v24, %v285_v12  ;;  %v349_v32 = vsel %vm1098_vm1, %v1187_v25, %v287_v15  ;;  %v1209_v34 = vld [vmem:[#allocation2 + $0x108] sm:$0xff]  ;;  %v1220_v39 = vld [vmem:[#allocation2 + $0x110] sm:$0xff] }
  0x5f   : > { %v418_v14 = vsel %vm1121_vm3, %v386_v9, %v382_v7  ;;  %v351_v35 = vsel %vm1098_vm1, %v1196_v29, %v289_v16  ;;  %v381_v36 = vsel %vm1106_vm2, %v345_v30, %v337_v22  ;;  %v383_v37 = vsel %vm1106_vm2, %v347_v31, %v339_v26  ;;  %v1232_v45 = vld [vmem:[#allocation2 + $0x118] sm:$0xff]  ;;  %v1244_v55 = vld [vmem:[#allocation2 + $0x120] sm:$0xff]  ;;  %v1246_v60 = vld [vmem:[#allocation2 + $0x128] sm:$0xff] }
  0x60   : > { %v448_v18 = vsel %vm1140_vm4, %v418_v14, %v416_v13  ;;  %v385_v38 = vsel %vm1106_vm2, %v349_v32, %v341_v27  ;;  %v387_v40 = vsel %vm1106_vm2, %v351_v35, %v343_v28  ;;  %v352_v43 = vsel %vm1098_vm1, %v1207_v33, %v290_v48  ;;  %v1256_v5 = vld [vmem:[#allocation2 + $0x130] sm:$0xff]  ;;  %v1284_v12 = vld [vmem:[#allocation2 + $0x138] sm:$0xff] }
  0x61   : > { %474 = vst.msk [vmem:[%s1179_s3] sm:$0xff] %vm181_vm0, %v448_v18  ;;  %v417_v41 = vsel %vm1121_vm3, %v385_v38, %v381_v36  ;;  %v353_v44 = vsel %vm1098_vm1, %v1209_v34, %v291_v17  ;;  %v419_v46 = vsel %vm1121_vm3, %v387_v40, %v383_v37  ;;  %v388_v47 = vsel %vm1106_vm2, %v352_v43, %v344_v62  ;;  %v314_v16 = vld [vmem:[#allocation2 + $0x140] sm:$0xff]  ;;  %v315_v17 = vld [vmem:[#allocation2 + $0x148] sm:$0xff] }
  0x62   : > { %v389_v54 = vsel %vm1106_vm2, %v353_v44, %v345_v30  ;;  %v354_v48 = vsel %vm1098_vm1, %v1220_v39, %v1104_v49  ;;  %v449_v61 = vsel %vm1140_vm4, %v419_v46, %v417_v41  ;;  %v420_v3 = vsel %vm1121_vm3, %v388_v47, %v384_v8  ;;  %v316_v22 = vld [vmem:[#allocation2 + $0x150] sm:$0xff] }
  0x63   : > { %v421_v62 = vsel %vm1121_vm3, %v389_v54, %v385_v38  ;;  %v390_v4 = vsel %vm1106_vm2, %v354_v48, %v346_v0  ;;  %475 = vst.msk [vmem:[%s1179_s3 + $0x8] sm:$0xff] %vm181_vm0, %v449_v61  ;;  %v450_v49 = vsel %vm1140_vm4, %v420_v3, %v418_v14  ;;  %v355_v8 = vsel %vm1098_vm1, %v1232_v45, %v293_v19  ;;  %v318_v38 = vld [vmem:[#allocation2 + $0x160] sm:$0xff] }
  0x64   : > { %v451_v6 = vsel %vm1140_vm4, %v421_v62, %v419_v46  ;;  %v422_v7 = vsel %vm1121_vm3, %v390_v4, %v386_v9  ;;  %476 = vst.msk [vmem:[%s1179_s3 + $0x10] sm:$0xff] %vm181_vm0, %v450_v49  ;;  %v391_v10 = vsel %vm1106_vm2, %v355_v8, %v347_v31  ;;  %v356_v9 = vsel %vm1098_vm1, %v1244_v55, %v1110_v51 }
  0x65   : > { %477 = vst.msk [vmem:[%s1179_s3 + $0x18] sm:$0xff] %vm181_vm0, %v451_v6  ;;  %v452_v0 = vsel %vm1140_vm4, %v422_v7, %v420_v3  ;;  %v357_v11 = vsel %vm1098_vm1, %v1246_v60, %v295_v20  ;;  %v423_v13 = vsel %vm1121_vm3, %v391_v10, %v387_v40  ;;  %v392_v14 = vsel %vm1106_vm2, %v356_v9, %v1150_v1 }
  0x66   : > { %478 = vst.msk [vmem:[%s1179_s3 + $0x20] sm:$0xff] %vm181_vm0, %v452_v0  ;;  %v393_v51 = vsel %vm1106_vm2, %v357_v11, %v349_v32  ;;  %v358_v15 = vsel %vm1098_vm1, %v1256_v5, %v1112_v52  ;;  %v453_v18 = vsel %vm1140_vm4, %v423_v13, %v421_v62  ;;  %v424_v19 = vsel %vm1121_vm3, %v392_v14, %v388_v47 }
  0x67   : > { %v425_v1 = vsel %vm1121_vm3, %v393_v51, %v389_v54  ;;  %v394_v20 = vsel %vm1106_vm2, %v358_v15, %v1155_v2  ;;  %479 = vst.msk [vmem:[%s1179_s3 + $0x28] sm:$0xff] %vm181_vm0, %v453_v18  ;;  %v454_v52 = vsel %vm1140_vm4, %v424_v19, %v422_v7  ;;  %v359_v28 = vsel %vm1098_vm1, %v1284_v12, %v1173_v21  ;;  %v317_v21 = vld [vmem:[#allocation2 + $0x158] sm:$0xff] }
  0x68   : > { %v455_v26 = vsel %vm1140_vm4, %v425_v1, %v423_v13  ;;  %v426_v27 = vsel %vm1121_vm3, %v394_v20, %v390_v4  ;;  %480 = vst.msk [vmem:[%s1179_s3 + $0x30] sm:$0xff] %vm181_vm0, %v454_v52  ;;  %v395_v30 = vsel %vm1106_vm2, %v359_v28, %v351_v35  ;;  %v360_v31 = vsel %vm1098_vm1, %v314_v16, %v1114_v53  ;;  %v321_v4 = vld [vmem:[#allocation2 + $0x178] sm:$0xff]  ;;  %v324_v13 = vld [vmem:[#allocation2 + $0x190] sm:$0xff]  ;;  %v327_v52 = vld [vmem:[#allocation2 + $0x1a8] sm:$0xff] }
  0x69   : > { %481 = vst.msk [vmem:[%s1179_s3 + $0x38] sm:$0xff] %vm181_vm0, %v455_v26  ;;  %v456_v2 = vsel %vm1140_vm4, %v426_v27, %v424_v19  ;;  %v361_v32 = vsel %vm1098_vm1, %v315_v17, %v1183_v23  ;;  %v427_v36 = vsel %vm1121_vm3, %v395_v30, %v391_v10  ;;  %v396_v37 = vsel %vm1106_vm2, %v360_v31, %v352_v43  ;;  %v319_v23 = vld [vmem:[#allocation2 + $0x168] sm:$0xff]  ;;  %v325_v19 = vld [vmem:[#allocation2 + $0x198] sm:$0xff] }
  0x6a   : > { %482 = vst.msk [vmem:[%s1179_s3 + $0x40] sm:$0xff] %vm181_vm0, %v456_v2  ;;  %v397_v35 = vsel %vm1106_vm2, %v361_v32, %v353_v44  ;;  %v362_v53 = vsel %vm1098_vm1, %v316_v22, %v1125_v57  ;;  %v457_v40 = vsel %vm1140_vm4, %v427_v36, %v425_v1  ;;  %v428_v41 = vsel %vm1121_vm3, %v396_v37, %v392_v14  ;;  %v320_v44 = vld [vmem:[#allocation2 + $0x170] sm:$0xff] }
  0x6b   : > { %v429_v43 = vsel %vm1121_vm3, %v397_v35, %v393_v51  ;;  %v398_v46 = vsel %vm1106_vm2, %v362_v53, %v354_v48  ;;  %483 = vst.msk [vmem:[%s1179_s3 + $0x48] sm:$0xff] %vm181_vm0, %v457_v40  ;;  %v458_v57 = vsel %vm1140_vm4, %v428_v41, %v426_v27  ;;  %v363_v61 = vsel %vm1098_vm1, %v317_v21, %v1185_v24 }
  0x6c   : > { %v459_v47 = vsel %vm1140_vm4, %v429_v43, %v427_v36  ;;  %v430_v54 = vsel %vm1121_vm3, %v398_v46, %v394_v20  ;;  %484 = vst.msk [vmem:[%s1179_s3 + $0x50] sm:$0xff] %vm181_vm0, %v458_v57  ;;  %v399_v3 = vsel %vm1106_vm2, %v363_v61, %v355_v8  ;;  %v364_v62 = vsel %vm1098_vm1, %v318_v38, %v1127_v58  ;;  %v323_v8 = vld [vmem:[#allocation2 + $0x188] sm:$0xff] }
  0x6d   : > { %485 = vst.msk [vmem:[%s1179_s3 + $0x58] sm:$0xff] %vm181_vm0, %v459_v47  ;;  %v460_v48 = vsel %vm1140_vm4, %v430_v54, %v428_v41  ;;  %v365_v24 = vsel %vm1098_vm1, %v319_v23, %v1187_v25  ;;  %v431_v49 = vsel %vm1121_vm3, %v399_v3, %v395_v30  ;;  %v400_v6 = vsel %vm1106_vm2, %v364_v62, %v356_v9  ;;  %v322_v25 = vld [vmem:[#allocation2 + $0x180] sm:$0xff]  ;;  %v328_v30 = vld [vmem:[#allocation2 + $0x1b0] sm:$0xff] }
  0x6e   : > { %486 = vst.msk [vmem:[%s1179_s3 + $0x60] sm:$0xff] %vm181_vm0, %v460_v48  ;;  %v401_v7 = vsel %vm1106_vm2, %v365_v24, %v357_v11  ;;  %v366_v58 = vsel %vm1098_vm1, %v320_v44, %v1129_v59  ;;  %v461_v0 = vsel %vm1140_vm4, %v431_v49, %v429_v43  ;;  %v432_v10 = vsel %vm1121_vm3, %v400_v6, %v396_v37 }
  0x6f   : > { %v433_v9 = vsel %vm1121_vm3, %v401_v7, %v397_v35  ;;  %v402_v11 = vsel %vm1106_vm2, %v366_v58, %v358_v15  ;;  %487 = vst.msk [vmem:[%s1179_s3 + $0x68] sm:$0xff] %vm181_vm0, %v461_v0  ;;  %v462_v59 = vsel %vm1140_vm4, %v432_v10, %v430_v54  ;;  %v367_v16 = vsel %vm1098_vm1, %v321_v4, %v1196_v29 }
  0x70   : > { %v463_v14 = vsel %vm1140_vm4, %v433_v9, %v431_v49  ;;  %v434_v51 = vsel %vm1121_vm3, %v402_v11, %v398_v46  ;;  %488 = vst.msk [vmem:[%s1179_s3 + $0x70] sm:$0xff] %vm181_vm0, %v462_v59  ;;  %v403_v17 = vsel %vm1106_vm2, %v367_v16, %v359_v28  ;;  %v368_v18 = vsel %vm1098_vm1, %v322_v25, %v1207_v33 }
  0x71   : > { %489 = vst.msk [vmem:[%s1179_s3 + $0x78] sm:$0xff] %vm181_vm0, %v463_v14  ;;  %v464_v15 = vsel %vm1140_vm4, %v434_v51, %v432_v10  ;;  %v369_v29 = vsel %vm1098_vm1, %v323_v8, %v1209_v34  ;;  %v435_v1 = vsel %vm1121_vm3, %v403_v17, %v399_v3  ;;  %v404_v20 = vsel %vm1106_vm2, %v368_v18, %v360_v31  ;;  %v326_v34 = vld [vmem:[#allocation2 + $0x1a0] sm:$0xff] }
  0x72   : > { %490 = vst.msk [vmem:[%s1179_s3 + $0x80] sm:$0xff] %vm181_vm0, %v464_v15  ;;  %v405_v22 = vsel %vm1106_vm2, %v369_v29, %v361_v32  ;;  %v370_v33 = vsel %vm1098_vm1, %v324_v13, %v1220_v39  ;;  %v465_v26 = vsel %vm1140_vm4, %v435_v1, %v433_v9  ;;  %v436_v27 = vsel %vm1121_vm3, %v404_v20, %v400_v6 }
  0x73   : > { %v437_v28 = vsel %vm1121_vm3, %v405_v22, %v401_v7  ;;  %v406_v2 = vsel %vm1106_vm2, %v370_v33, %v362_v53  ;;  %491 = vst.msk [vmem:[%s1179_s3 + $0x88] sm:$0xff] %vm181_vm0, %v465_v26  ;;  %v466_v39 = vsel %vm1140_vm4, %v436_v27, %v434_v51  ;;  %v371_v21 = vsel %vm1098_vm1, %v325_v19, %v1232_v45  ;;  %v329_v53 = vld [vmem:[#allocation2 + $0x1b8] sm:$0xff] }
  0x74   : > { %v467_v31 = vsel %vm1140_vm4, %v437_v28, %v435_v1  ;;  %v438_v32 = vsel %vm1121_vm3, %v406_v2, %v402_v11  ;;  %492 = vst.msk [vmem:[%s1179_s3 + $0x90] sm:$0xff] %vm181_vm0, %v466_v39  ;;  %v407_v37 = vsel %vm1106_vm2, %v371_v21, %v363_v61  ;;  %v372_v45 = vsel %vm1098_vm1, %v326_v34, %v1244_v55 }
  0x75   : > { %493 = vst.msk [vmem:[%s1179_s3 + $0x98] sm:$0xff] %vm181_vm0, %v467_v31  ;;  %v468_v36 = vsel %vm1140_vm4, %v438_v32, %v436_v27  ;;  %v373_v35 = vsel %vm1098_vm1, %v327_v52, %v1246_v60  ;;  %v439_v38 = vsel %vm1121_vm3, %v407_v37, %v403_v17  ;;  %v408_v23 = vsel %vm1106_vm2, %v372_v45, %v364_v62 }
  0x76   : > { %494 = vst.msk [vmem:[%s1179_s3 + $0xa0] sm:$0xff] %vm181_vm0, %v468_v36  ;;  %v409_v40 = vsel %vm1106_vm2, %v373_v35, %v365_v24  ;;  %v374_v55 = vsel %vm1098_vm1, %v328_v30, %v1256_v5  ;;  %v469_v60 = vsel %vm1140_vm4, %v439_v38, %v437_v28  ;;  %v440_v41 = vsel %vm1121_vm3, %v408_v23, %v404_v20 }
  0x77   : > { %v441_v43 = vsel %vm1121_vm3, %v409_v40, %v405_v22  ;;  %v410_v46 = vsel %vm1106_vm2, %v374_v55, %v366_v58  ;;  %495 = vst.msk [vmem:[%s1179_s3 + $0xa8] sm:$0xff] %vm181_vm0, %v469_v60  ;;  %v470_v5 = vsel %vm1140_vm4, %v440_v41, %v438_v32  ;;  %v375_v47 = vsel %vm1098_vm1, %v329_v53, %v1284_v12 }
  0x78   : > { %v471_v44 = vsel %vm1140_vm4, %v441_v43, %v439_v38  ;;  %v442_v57 = vsel %vm1121_vm3, %v410_v46, %v406_v2  ;;  %496 = vst.msk [vmem:[%s1179_s3 + $0xb0] sm:$0xff] %vm181_vm0, %v470_v5  ;;  %v411_v61 = vsel %vm1106_vm2, %v375_v47, %v367_v16 }
  0x79   : > { %497 = vst.msk [vmem:[%s1179_s3 + $0xb8] sm:$0xff] %vm181_vm0, %v471_v44  ;;  %v472_v54 = vsel %vm1140_vm4, %v442_v57, %v440_v41  ;;  %v443_v48 = vsel %vm1121_vm3, %v411_v61, %v407_v37 }
  0x7a   : > { %498 = vst.msk [vmem:[%s1179_s3 + $0xc0] sm:$0xff] %vm181_vm0, %v472_v54  ;;  %v473_v42 = vsel %vm1140_vm4, %v443_v48, %v441_v43 }
  0x7b   : > { %499 = vst.msk [vmem:[%s1179_s3 + $0xc8] sm:$0xff] %vm181_vm0, %v473_v42 }
  0x7c   : > { %765 = shalt.err (!%p762_p3)
}
  0x7d   : > { %s766_s29 = scalar_lea.hbm %s1519_s4, 3328  ;;  %s770_s3 = scalar_lea.hbm %s1580_s1, 26624 }
  0x7e   : > { %p767_p5 = scmp.ne.s32.totalorder %s1519_s4, %s766_s29  ;;  %p771_p2 = scmp.lt.u32.totalorder %s1519_s4, %s1580_s1 }
  0x7f   : > { %p772_p4 = scmp.lt.u32.totalorder %s770_s3, %s766_s29  ;;  %p774_p8 = scmp.lt.u32.totalorder %s766_s29, %s1519_s4 }
  0x80   : > { %p768_p6 = pnand %p767_p5, %p1595_p9 }
  0x81   : > { %p773_p10 = por %p772_p4, %p771_p2 }
  0x82   : > { %p769_p7 = pneg %p768_p6 }
  0x83   : > { %p775_p12 = por %p774_p8, %p773_p10 }
  0x85   : > { %p776_p0 = pnand %p775_p12, %p769_p7 }
  0x87   : > { %779 = shalt.err (!%p776_p0)
}
  0x88   : > { %s857_s10 = smov 128   ;;  %s858_s9 = smov 8  }
  0x89   : > { %641 = dma.vmem_to_hbm [thread:$0]  (%p1595_p9), %s1521_s23, 3328, %s1519_s4, %s501_s5, %s857_s10, %s857_s10, %s858_s9  }
  0x8a PF: > { %p652_p11 = scmp.ge.s32.totalorder %s850_s13, 2  ;;  %s534_s2 = sand.u32 1, %s822_s6  }
  0x8b   : > { %p1596_p13 = scmp.ne.s32.totalorder %s1585_s25, 0  ;;  %s535_s26 = scalar_lea.sflag [#allocation5], %s534_s2 }
  0x8d   : > { %p648_p1 = pnand %p652_p11, %p1596_p13 }
  0x8f   : > { %817 = dma.done.wait (!%p648_p1), %s535_s26, 3328  }
  0x90   : > { %819 = vsyncadd (!%p648_p1), %s535_s26, 4294963968  ;;  %s17_s13 = sadd.s32 1, %s850_s13   ;;  %s1597_s6 = smov %s826_s7 }
  0x91   : > { %p14_p3 = scmp.ge.s32.totalorder %s17_s13, 10   ;;  %s1598_s7 = smov %s830_s8 }
  0x92   : > { %s1599_s8 = smov %s947_s27  ;;  %s1600_s9 = smov %s842_s11 }
  0x93   : > { %s1601_s10 = smov %s846_s12  ;;  %s1602_s11 = smov %s1605_s16 }
  0x94   : > { %s1603_s12 = smov %s1609_s17  ;;  %16 = sbr.rel (!%p14_p3) target bundleno = 7 (0x7), region = 72 }
  0x9b   :  { %540 = vsyncpa [#allocation4], 1 }
  0x9c   :  { %542 = vsyncpa [#allocation4 + $0x1], 1 }
  0x9d   :  { %543 = vsyncpa [#allocation5], 1 }
  0x9e   :  { %545 = vsyncpa [#allocation5 + $0x1], 1 }

</bundles_post_ra>
